<compile_context>
chip_gen: v7x
topology: tpu7x:2x2x1
jax: 0.10.0
libtpu: 0.0.40
codegen_flags: <defaults>
</compile_context>

<pallas_src>
import functools
import math

import jax
import jax.numpy as jnp
from jax.experimental import pallas as pl
from jax.experimental.pallas import tpu as pltpu


def _layer_norm_f32(x, eps):
    """LayerNorm over the last dim, no affine params. x is f32 [TM, D]."""
    mean = jnp.mean(x, axis=-1, keepdims=True)
    centered = x - mean
    var = jnp.mean(centered * centered, axis=-1, keepdims=True)
    return centered * jax.lax.rsqrt(var + eps)   # rsqrt: single EUP op


def residual_kernel(before_ref, after_ref, o_ref, *, mode, eps):
    before = before_ref[...]
    after = after_ref[...]

    if mode == "none":
        # Pure residual add: stay in the native dtype (no f32 round-trip).
        o_ref[...] = (before + after).astype(o_ref.dtype)
        return

    # Cast only when necessary (no-op for f32 inputs).
    b32 = before if before.dtype == jnp.float32 else before.astype(jnp.float32)
    a32 = after if after.dtype == jnp.float32 else after.astype(jnp.float32)

    if mode == "pre":
        out = b32 + _layer_norm_f32(a32, eps)
    else:  # 'post'
        out = _layer_norm_f32(b32 + a32, eps)

    o_ref[...] = out.astype(o_ref.dtype)


def _round_up(x, m):
    return (x + m - 1) // m * m


def residual_forward(before, after, *, normalize="pre", eps=1e-5,
                     target_block_bytes=2 * 1024 * 1024,
                     vmem_budget_bytes=12 * 1024 * 1024,
                     min_row_blocks=4):
    """before/after: [..., D] arrays of identical shape/dtype -> same shape out."""
    assert before.shape == after.shape, "before/after must have equal shapes"
    assert before.dtype == after.dtype, "before/after must have equal dtypes"
    assert normalize in ("pre", "post", "none")

    orig_shape = before.shape
    D = orig_shape[-1]
    M = int(math.prod(orig_shape[:-1])) if len(orig_shape) > 1 else 1

    b2 = before.reshape(M, D)
    a2 = after.reshape(M, D)

    itemsize = jnp.dtype(before.dtype).itemsize
    # Sublane packing: 8 rows for 32-bit, 16 for 16-bit, 32 for 8-bit dtypes.
    sublane = max(8, 32 // itemsize)
    row_bytes = D * itemsize

    # Largest row-tile under the per-block target (~2 MiB DMA sweet spot).
    tm_target = max(sublane, (target_block_bytes // row_bytes) // sublane * sublane)
    # 3 arrays (2 in + 1 out) x 2 pipeline buffers must stay under the budget.
    tm_cap = max(sublane, (vmem_budget_bytes // (6 * row_bytes)) // sublane * sublane)
    # Keep >= min_row_blocks grid steps (when M allows) so v7x megacore
    # sharding has blocks for both TensorCores.
    tm_parallel = max(sublane, _round_up(pl.cdiv(M, min_row_blocks), sublane))

    TM = max(sublane, min(tm_target, tm_cap, tm_parallel))

    # Sanity: 6 double-buffered (TM, D) blocks must fit scoped-VMEM defaults
    # (16 MiB v5e, 32 MiB v6e/v7x). Only violated for extreme D.
    assert 6 * TM * row_bytes <= 14 * 1024 * 1024, (
        "hidden dim too large for a single lane tile; tile D as well")

    # Ragged last block is fine: rows are fully independent; out-of-range rows
    # of the partial block are computed on scratch data but never written back.
    grid = (pl.cdiv(M, TM),)

    kernel = functools.partial(residual_kernel, mode=normalize, eps=eps)
    out = pl.pallas_call(
        kernel,
        out_shape=jax.ShapeDtypeStruct((M, D), before.dtype),
        grid=grid,
        in_specs=[
            pl.BlockSpec((TM, D), lambda i: (i, 0)),
            pl.BlockSpec((TM, D), lambda i: (i, 0)),
        ],
        out_specs=pl.BlockSpec((TM, D), lambda i: (i, 0)),
        compiler_params=pltpu.CompilerParams(
            dimension_semantics=("parallel",),  # megacore-shardable on v7x
        ),
    )(b2, a2)

    return out.reshape(orig_shape)


def reference_forward(before, after, normalize="pre", eps=1e-5):
    """Pure-JAX reference (computed in f32)."""
    b32 = before.astype(jnp.float32)
    a32 = after.astype(jnp.float32)

    def ln(x):
        m = jnp.mean(x, axis=-1, keepdims=True)
        v = jnp.mean(jnp.square(x - m), axis=-1, keepdims=True)
        return (x - m) / jnp.sqrt(v + eps)

    if normalize == "pre":
        return b32 + ln(a32)
    if normalize == "post":
        return ln(b32 + a32)
    return b32 + a32


if __name__ == "__main__":
    key = jax.random.PRNGKey(0)
    kb, ka = jax.random.split(key)

    # Small shapes implied by the module: batch=2, seq=8, hidden=128
    # (hidden a multiple of 128 for lane-dense stores).
    B, S, D = 2, 8, 128
    before = jax.random.normal(kb, (B, S, D), dtype=jnp.float32)
    after = jax.random.normal(ka, (B, S, D), dtype=jnp.float32)

    for mode in ("pre", "post", "none"):
        # Tiny target block -> multiple row tiles even at this toy size,
        # exercising the tiled/pipelined path (large inputs just get more tiles).
        out = residual_forward(before, after, normalize=mode,
                               target_block_bytes=4 * 1024)
        out = jax.block_until_ready(out)
        ref = reference_forward(before, after, normalize=mode)
        assert out.shape == before.shape
        assert jnp.allclose(out.astype(jnp.float32), ref,
                            atol=1e-4, rtol=1e-4), f"mismatch ({mode})"

    # bf16 + ragged row count: exercises the 16-row sublane tile and the
    # partial last block (no pad/slice round-trips).
    Br, Sr = 3, 5
    before_bf = jax.random.normal(kb, (Br, Sr, D), dtype=jnp.float32).astype(jnp.bfloat16)
    after_bf = jax.random.normal(ka, (Br, Sr, D), dtype=jnp.float32).astype(jnp.bfloat16)
    out_bf = residual_forward(before_bf, after_bf, normalize="pre")
    out_bf = jax.block_until_ready(out_bf)
    ref_bf = reference_forward(before_bf, after_bf, normalize="pre")
    assert out_bf.shape == before_bf.shape
    assert out_bf.dtype == jnp.bfloat16
    assert jnp.allclose(out_bf.astype(jnp.float32), ref_bf, atol=5e-2, rtol=5e-2), \
        "mismatch (bf16 pre)"

    print("KERNEL_OK")
</pallas_src>

<mosaic_0001>
module attributes {stable_mosaic.version = 11 : i64} {
  func.func @residual_kernel(%arg0: i32, %arg1: memref<8x128xf32, #tpu.memory_space<vmem>>, %arg2: memref<8x128xf32, #tpu.memory_space<vmem>>, %arg3: memref<8x128xf32, #tpu.memory_space<vmem>>) attributes {dimension_semantics = [#tpu.dimension_semantics<parallel>], iteration_bounds = array<i64: 2>, scalar_prefetch = 0 : i64, scratch_operands = 0 : i64, tpu.core_type = #tpu.core_type<tc>, window_params = [{transform_indices = @transform_0, window_bounds = array<i64: 8, 128>}, {transform_indices = @transform_1, window_bounds = array<i64: 8, 128>}, {transform_indices = @transform_2, window_bounds = array<i64: 8, 128>}]} {
    %c0 = arith.constant 0 : index
    %c0_0 = arith.constant 0 : index
    %0 = vector.load %arg1[%c0, %c0_0] : memref<8x128xf32, #tpu.memory_space<vmem>>, vector<8x128xf32>
    %c0_1 = arith.constant 0 : index
    %c0_2 = arith.constant 0 : index
    %1 = vector.load %arg2[%c0_1, %c0_2] : memref<8x128xf32, #tpu.memory_space<vmem>>, vector<8x128xf32>
    %cst = arith.constant dense<0.000000e+00> : vector<8xf32>
    %2 = vector.multi_reduction <add>, %1, %cst [1] : vector<8x128xf32> to vector<8xf32>
    %3 = vector.shape_cast %2 : vector<8xf32> to vector<8x1xf32>
    %cst_3 = arith.constant 1.280000e+02 : f32
    %4 = vector.broadcast %cst_3 : f32 to vector<8x1xf32>
    %5 = arith.divf %3, %4 : vector<8x1xf32>
    %6 = vector.broadcast %5 : vector<8x1xf32> to vector<8x128xf32>
    %7 = arith.subf %1, %6 : vector<8x128xf32>
    %8 = arith.mulf %7, %7 : vector<8x128xf32>
    %cst_4 = arith.constant dense<0.000000e+00> : vector<8xf32>
    %9 = vector.multi_reduction <add>, %8, %cst_4 [1] : vector<8x128xf32> to vector<8xf32>
    %10 = vector.shape_cast %9 : vector<8xf32> to vector<8x1xf32>
    %cst_5 = arith.constant 1.280000e+02 : f32
    %11 = vector.broadcast %cst_5 : f32 to vector<8x1xf32>
    %12 = arith.divf %10, %11 : vector<8x1xf32>
    %cst_6 = arith.constant 9.99999974E-6 : f32
    %13 = vector.broadcast %cst_6 : f32 to vector<8x1xf32>
    %14 = arith.addf %12, %13 : vector<8x1xf32>
    %15 = math.rsqrt %14 : vector<8x1xf32>
    %16 = vector.broadcast %15 : vector<8x1xf32> to vector<8x128xf32>
    %17 = arith.mulf %7, %16 : vector<8x128xf32>
    %18 = arith.addf %0, %17 : vector<8x128xf32>
    %c0_7 = arith.constant 0 : index
    %c0_8 = arith.constant 0 : index
    %19 = vector.load %arg3[%c0_7, %c0_8] : memref<8x128xf32, #tpu.memory_space<vmem>>, vector<8x128xf32>
    tpu.vector_store %arg3[%c0_7, %c0_8], %18 {strides = array<i32>} : memref<8x128xf32, #tpu.memory_space<vmem>>, vector<8x128xf32>,
    return
  }
  func.func @transform_0(%arg0: i32) -> (i32, i32) {
    %c0_i32 = arith.constant 0 : i32
    %c0_i32_0 = arith.constant 0 : i32
    return %arg0, %c0_i32 : i32, i32
  }
  func.func @transform_1(%arg0: i32) -> (i32, i32) {
    %c0_i32 = arith.constant 0 : i32
    %c0_i32_0 = arith.constant 0 : i32
    return %arg0, %c0_i32 : i32, i32
  }
  func.func @transform_2(%arg0: i32) -> (i32, i32) {
    %c0_i32 = arith.constant 0 : i32
    %c0_i32_0 = arith.constant 0 : i32
    return %arg0, %c0_i32 : i32, i32
  }
}

</mosaic_0001>

<bundles_post_ra>
// kernel: tpu_custom_call.1
= control target key start
LH: loop header
LB: loop body
LE: loop exit
PB: predicated region body
PF: predicated region fallthrough
CT: control target
= control target key end

     0   :  { %7 = vsyncpa [#allocation3], 0  ;;  %s751_s0 = inlined_call_operand.hbm [shape: f32[16,128], index: 0, kind: input, shape index: {}]   ;;  %s752_s1 = inlined_call_operand.hbm [shape: f32[16,128], index: 1, kind: input, shape index: {}]   ;;  %s753_s2 = inlined_call_operand.hbm [shape: f32[16,128], index: 2, kind: output, shape index: {}]  }
   0x1   :  { %9 = vsyncpa [#allocation3 + $0x1], 0 }
   0x2   :  { %10 = vsyncpa [#allocation6], 0 }
   0x3   :  { %12 = vsyncpa [#allocation6 + $0x1], 0 }
   0x4   :  { %13 = vsyncpa [#allocation4], 0 }
   0x5   :  { %15 = vsyncpa [#allocation4 + $0x1], 0  ;;  %s537_s9 = smov 0   ;;  %s539_s10 = smov 0  }
   0x6   :  { %s541_s11 = smov 0   ;;  %s543_s12 = smov 0  }
   0x7 LB: > { %s558_s13 = sadd.s32 4294967295, %s517_s12   ;;  %s319_s14 = sadd.s32 4294967294, %s517_s12   ;;  %s517_s12 = sphi %s543_s12, %s772_s12   ;;  %s513_s11 = sphi %s541_s11, %s771_s11   ;;  %s509_s10 = sphi %s539_s10, %s770_s10   ;;  %s505_s9 = sphi %s537_s9, %s769_s9  }
   0x8   : > { %s562_s15 = sadd.s32 1, %s517_s12   ;;  %s28_s16 = sadd.s32 1, %s513_s11 }
   0x9   : > { %s25_s17 = ssub.s32 %s517_s12, %s562_s15  ;;  %p35_p0 = scmp.ne.s32.totalorder %s513_s11, %s509_s10 }
   0xa   : > { %p26_p1 = scmp.eq.s32.totalorder %s25_s17, 0  ;;  %p36_p2 = scmp.eq.s32.totalorder %s517_s12, 0 }
   0xb   : > { %p41_p3 = scmp.ne.s32.totalorder %s509_s10, %s505_s9  ;;  %p42_p4 = scmp.eq.s32.totalorder %s558_s13, 0 }
   0xc   : > { %s574_s18 = scalar_select %p26_p1, %s513_s11, %s28_s16  }
   0xd   : > { %p576_p5 = por %p36_p2, %p35_p0  ;;  %p580_p6 = por %p42_p4, %p41_p3 }
   0xe   : > { %p91_p7 = scmp.eq.s32.totalorder %s558_s13, 1  ;;  %p97_p8 = scmp.eq.s32.totalorder %s319_s14, 1 }
   0xf   : > { %s757_s20 = scalar_select %p580_p6, 1, 0 }
  0x10   : > { %p351_p10 = scmp.lt.s32.totalorder %s517_s12, 2  ;;  %p587_p11 = por %p91_p7, %p35_p0 }
  0x11   : > { %p591_p12 = por %p97_p8, %p41_p3  ;;  %s596_s23 = sand.u32 1, %s513_s11  }
  0x12   : > { %s758_s21 = scalar_select %p587_p11, 1, 0 }
  0x13   : > { %s759_s22 = scalar_select %p591_p12, 1, 0 }
  0x14   : > { %s323_s24 = sshll.u32 %s517_s12, 7  ;;  %s322_s25 = sshll.u32 %s596_s23, 3 }
  0x15   : > { %s605_s28 = scalar_lea.hbm %s751_s0, %s323_s24  ;;  %s121_s29 = scalar_lea.vmem [#allocation2], %s322_s25 }
  0x16   : > { %s128_s30 = sshll.u32 %s121_s29, 4  ;;  %p611_p13 = pnand %p351_p10, %p576_p5  ;;  %s615_s30 = int_to_ptr.vmem [resolvable:$true] %s128_s30 }
  0x17   : > { %s118_s4 = scalar_lea.sflag [#allocation3], %s596_s23  ;;  %s387_s5 = scalar_lea.hbm %s605_s28, 128 }
  0x18   : > { %p388_p2 = scmp.ne.s32.totalorder %s605_s28, %s387_s5  ;;  %p389_p3 = pneg %p611_p13 }
  0x19   : > { %s392_s8 = scalar_lea.hbm %s751_s0, 256  ;;  %p393_p5 = scmp.lt.u32.totalorder %s605_s28, %s751_s0 }
  0x1a   : > { %p390_p4 = pnand %p389_p3, %p388_p2  ;;  %p394_p8 = scmp.lt.u32.totalorder %s392_s8, %s387_s5 }
  0x1b   : > { %p396_p9 = scmp.lt.u32.totalorder %s387_s5, %s605_s28 }
  0x1c   : > { %p391_p7 = pneg %p390_p4  ;;  %p395_p10 = por %p394_p8, %p393_p5 }
  0x1e   : > { %p397_p0 = por %p396_p9, %p395_p10 }
  0x20   : > { %p398_p1 = pnand %p397_p0, %p391_p7 }
  0x22   : > { %401 = shalt.err (!%p398_p1)
}
  0x23   : > { %s402_s17 = scalar_lea.vmem %s615_s30, 128  ;;  %s519_s19 = smov [#allocation2]  }
  0x24   : > { %p403_p2 = scmp.ne.s32.totalorder %s615_s30, %s402_s17  ;;  %s407_s26 = sshll.u32 %s519_s19, 4  ;;  %s408_s26 = int_to_ptr.vmem [resolvable:$false] %s407_s26 }
  0x25   : > { %s409_s27 = scalar_lea.vmem %s408_s26, 256  ;;  %p410_p11 = scmp.lt.s32.totalorder %s615_s30, %s408_s26 }
  0x26   : > { %p405_p4 = pnand %p403_p2, %p389_p3  ;;  %p411_p5 = scmp.lt.s32.totalorder %s409_s27, %s402_s17 }
  0x28   : > { %p406_p12 = pneg %p405_p4  ;;  %p412_p8 = por %p411_p5, %p410_p11 }
  0x2a   : > { %p413_p9 = pnand %p412_p8, %p406_p12 }
  0x2c   : > { %416 = shalt.err (!%p413_p9)
}
  0x2d   : > { %343 = dma.hbm_to_vmem [thread:$0]  (!%p611_p13), %s605_s28, 128, %s615_s30, %s118_s4  }
  0x2e   : > { %p761_p0 = scmp.lt.s32.totalorder %s517_s12, 3  ;;  %p762_p1 = scmp.ge.s32.totalorder %s517_s12, 1 }
  0x2f   : > { %s658_s7 = scalar_lea.hbm %s752_s1, %s323_s24  ;;  %s139_s8 = scalar_lea.vmem [#allocation5], %s322_s25 }
  0x30   : > { %p649_p7 = pnand %p762_p1, %p761_p0  ;;  %s146_s14 = sshll.u32 %s139_s8, 4  ;;  %s147_s14 = int_to_ptr.vmem [resolvable:$true] %s146_s14 }
  0x31   : > { %s136_s28 = scalar_lea.sflag [#allocation6], %s596_s23  ;;  %s417_s30 = scalar_lea.hbm %s658_s7, 128 }
  0x32   : > { %s763_s29 = scalar_select %p649_p7, 1, 0 }
  0x33   : > { %p418_p11 = scmp.ne.s32.totalorder %s658_s7, %s417_s30  ;;  %s422_s24 = scalar_lea.hbm %s752_s1, 256 }
  0x34   : > { %p423_p2 = scmp.lt.u32.totalorder %s658_s7, %s752_s1  ;;  %p424_p4 = scmp.lt.u32.totalorder %s422_s24, %s417_s30 }
  0x35   : > { %p420_p12 = pnand %p418_p11, %p389_p3  ;;  %p426_p8 = scmp.lt.u32.totalorder %s417_s30, %s658_s7 }
  0x36   : > { %p425_p5 = por %p424_p4, %p423_p2 }
  0x37   : > { %p421_p10 = pneg %p420_p12 }
  0x38   : > { %p427_p9 = por %p426_p8, %p425_p5 }
  0x3a   : > { %p428_p0 = pnand %p427_p9, %p421_p10 }
  0x3c   : > { %431 = shalt.err (!%p428_p0)
}
  0x3d   : > { %s432_s23 = scalar_lea.vmem %s147_s14, 128  ;;  %s520_s25 = smov [#allocation5]  }
  0x3e   : > { %p433_p1 = scmp.ne.s32.totalorder %s147_s14, %s432_s23  ;;  %s437_s26 = sshll.u32 %s520_s25, 4  ;;  %s438_s26 = int_to_ptr.vmem [resolvable:$false] %s437_s26 }
  0x3f   : > { %s439_s27 = scalar_lea.vmem %s438_s26, 256  ;;  %p440_p6 = scmp.lt.s32.totalorder %s147_s14, %s438_s26 }
  0x40   : > { %p435_p11 = pnand %p433_p1, %p389_p3  ;;  %p441_p7 = scmp.lt.s32.totalorder %s439_s27, %s432_s23 }
  0x42   : > { %p436_p12 = pneg %p435_p11  ;;  %p442_p2 = por %p441_p7, %p440_p6 }
  0x44   : > { %p443_p4 = pnand %p442_p2, %p436_p12 }
  0x46   : > { %446 = shalt.err (!%p443_p4)
}
  0x47   : > { %346 = dma.hbm_to_vmem [thread:$0]  (!%p611_p13), %s658_s7, 128, %s147_s14, %s136_s28  }
  0x48   : > { %p764_p10 = scmp.ne.s32.totalorder %s763_s29, 0 }
  0x49   : > { %s685_s5 = sand.u32 (!%p764_p10), 1, %s509_s10   ;;  %p765_p6 = scmp.ne.s32.totalorder (!%p764_p10), %s757_s20, 0 }
  0x4a   : > { %155 = sbr.rel (%p764_p10) target bundleno = 408 (0x198), region = 28  ;;  %s688_s6 = sshll.u32 (!%p764_p10), %s685_s5, 3 }
  0x4b   : > { %s158_s8 = scalar_lea.sflag (!%p764_p10), [#allocation3], %s685_s5  ;;  %s161_s30 = scalar_lea.vmem (!%p764_p10), [#allocation2], %s688_s6 }
  0x51   : > { %492 = dma.done.wait (%p765_p6), %s158_s8, 128  }
  0x52   : > { %494 = vsyncadd (%p765_p6), %s158_s8, 4294967168  ;;  %s167_s3 = scalar_lea.sflag [#allocation6], %s685_s5  ;;  %s170_s29 = scalar_lea.vmem [#allocation5], %s688_s6 }
  0x53   : > { %496 = dma.done.wait (%p765_p6), %s167_s3, 128  }
  0x54   : > { %498 = vsyncadd (%p765_p6), %s167_s3, 4294967168  ;;  %v197_v0 = vld [vmem:[%s170_s29] sm:$0xff]  ;;  %v196_v9 = vld [vmem:[%s161_s30] sm:$0xff]  ;;  %s331_s7 = sshll.u32 %s558_s13, 7  ;;  %s195_s20 = scalar_lea.vmem [#allocation7], %s688_s6 }
  0x55   : > { %198 = vadd.xlane.f32.xlu0 %v197_v0  ;;  %s226_s14 = sshll.u32 %s195_s20, 4  ;;  %s707_s16 = scalar_lea.hbm %s753_s2, %s331_s7  ;;  %s709_s14 = int_to_ptr.vmem [resolvable:$true] %s226_s14 }
  0x56   : > { %s213_s24 = scalar_lea.sflag [#allocation4], %s685_s5  ;;  %s447_s17 = scalar_lea.vmem %s709_s14, 128 }
  0x57   : > { %p448_p13 = scmp.ne.s32.totalorder %s709_s14, %s447_s17  ;;  %p766_p3 = scmp.ne.s32.totalorder %s758_s21, 0 }
  0x58   : > { %s521_s13 = smov [#allocation7]  }
  0x59   : > { %p449_p7 = pnand %p448_p13, %p766_p3  ;;  %s451_s19 = sshll.u32 %s521_s13, 4  ;;  %s452_s19 = int_to_ptr.vmem [resolvable:$false] %s451_s19 }
  0x5a   : > { %s453_s23 = scalar_lea.vmem %s452_s19, 256  ;;  %p454_p8 = scmp.lt.s32.totalorder %s709_s14, %s452_s19 }
  0x5b   : > { %p450_p5 = pneg %p449_p7  ;;  %p455_p9 = scmp.lt.s32.totalorder %s453_s23, %s447_s17 }
  0x5d   : > { %p456_p0 = por %p455_p9, %p454_p8 }
  0x5f   : > { %p457_p1 = pnand %p456_p0, %p450_p5 }
  0xe2   : > { %v199_v1 = vpop.xlane.xlu0 %198 }
  0xe3   : > { %v201_v2 = vmul.f32 0.0078125, %v199_v1 }
  0xe5   : > { %v202_v3 = vsub.f32 %v197_v0, %v201_v2 }
  0xe7   : > { %v203_v4 = vmul.f32 %v202_v3, %v202_v3 }
  0xe9   : > { %204 = vadd.xlane.f32.xlu0 %v203_v4 }
 0x176   : > { %v205_v5 = vpop.xlane.xlu0 %204 }
 0x177   : > { %v206_v6 = vmul.f32 0.0078125, %v205_v5 }
 0x179   : > { %v207_v7 = vadd.f32 1e-05, %v206_v6 }
 0x17b   : > { %385 = vrsqrt.f32 %v207_v7 }
 0x185   : > { %v386_v8 = vpop.eup %385 }
 0x186   : > { %v209_v10 = vmul.f32 %v386_v8, %v202_v3 }
 0x188   : > { %v210_v11 = vadd.f32 %v209_v10, %v196_v9 }
 0x18a   : > { %211 = vst [vmem:[%s195_s20] sm:$0xff] %v210_v11 }
 0x18b   : > { %460 = shalt.err (!%p457_p1)
}
 0x18c   : > { %s461_s25 = scalar_lea.hbm %s707_s16, 128  ;;  %s465_s5 = scalar_lea.hbm %s753_s2, 256 }
 0x18d   : > { %p462_p11 = scmp.ne.s32.totalorder %s707_s16, %s461_s25  ;;  %p466_p4 = scmp.lt.u32.totalorder %s707_s16, %s753_s2 }
 0x18e   : > { %p467_p10 = scmp.lt.u32.totalorder %s465_s5, %s461_s25  ;;  %p469_p13 = scmp.lt.u32.totalorder %s461_s25, %s707_s16 }
 0x18f   : > { %p463_p12 = pnand %p462_p11, %p766_p3 }
 0x190   : > { %p468_p6 = por %p467_p10, %p466_p4 }
 0x191   : > { %p464_p2 = pneg %p463_p12 }
 0x192   : > { %p470_p7 = por %p469_p13, %p468_p6 }
 0x194   : > { %p471_p5 = pnand %p470_p7, %p464_p2 }
 0x196   : > { %474 = shalt.err (!%p471_p5)
}
 0x197   : > { %338 = dma.vmem_to_hbm [thread:$0]  (%p766_p3), %s709_s14, 128, %s707_s16, %s213_s24  }
 0x198 PF: > { %s238_s30 = sand.u32 1, %s505_s9   ;;  %p767_p8 = scmp.ne.s32.totalorder %s759_s22, 0 }
 0x199   : > { %p768_p9 = scmp.ge.s32.totalorder %s517_s12, 2  ;;  %s239_s3 = scalar_lea.sflag [#allocation4], %s238_s30 }
 0x19b   : > { %p348_p0 = pnand %p768_p9, %p767_p8 }
 0x19d   : > { %500 = dma.done.wait (!%p348_p0), %s239_s3, 128  }
 0x19e   : > { %502 = vsyncadd (!%p348_p0), %s239_s3, 4294967168  ;;  %p18_p1 = scmp.ge.s32.totalorder %s562_s15, 4   ;;  %s769_s9 = smov %s509_s10 }
 0x19f   : > { %s770_s10 = smov %s513_s11  ;;  %s771_s11 = smov %s574_s18 }
 0x1a0   : > { %s772_s12 = smov %s562_s15  ;;  %20 = sbr.rel (!%p18_p1) target bundleno = 7 (0x7), region = 86 }
 0x1a7   :  { %244 = vsyncpa [#allocation3], 1 }
 0x1a8   :  { %246 = vsyncpa [#allocation3 + $0x1], 1 }
 0x1a9   :  { %247 = vsyncpa [#allocation6], 1 }
 0x1aa   :  { %249 = vsyncpa [#allocation6 + $0x1], 1 }
 0x1ab   :  { %250 = vsyncpa [#allocation4], 1 }
 0x1ac   :  { %252 = vsyncpa [#allocation4 + $0x1], 1 }

</bundles_post_ra>
